<compile_context>
chip_gen: v7x
topology: tpu7x:2x2x1
jax: 0.10.0
libtpu: 0.0.40
codegen_flags: <defaults>
</compile_context>

<pallas_src>
import jax
import jax.numpy as jnp
from jax.experimental import pallas as pl
from jax.experimental.pallas import tpu as pltpu

IN_DIM = 100
H1 = 256
H2 = 128
OUT_DIM = 10


def _round_up(n, m):
    return (n + m - 1) // m * m


def _cdiv(a, b):
    return -(-a // b)


def _pick_batch_tile(B, max_tile):
    """Batch tile: multiple of 16, <= max_tile, >= 2 grid steps when the batch
    allows (feeds both v7x TensorCores), small tail padding."""
    max_tile = max(16, (max_tile // 16) * 16)
    pB16 = _round_up(B, 16)            # minimal sublane-legal padded batch
    if pB16 <= max_tile:
        if pB16 >= 32:                 # split in two so the parallel grid has 2 steps
            return _round_up(_cdiv(pB16, 2), 16)
        return pB16
    n_steps = _cdiv(pB16, max_tile)    # big batch: minimize padding at <= max_tile
    return _round_up(_cdiv(pB16, n_steps), 16)


def mlp_kernel(x_ref, w1_ref, b1_ref, w2_ref, b2_ref, w3_ref, b3_ref, o_ref):
    # x arrives f32 from HBM; cast to bf16 for the MXU (f32 accumulation).
    xb = x_ref[...].astype(jnp.bfloat16)
    # layer 1: (TB,100)bf16 @ (100,256)bf16 -> f32, +bias, ReLU (f32 VPU path)
    h1 = jnp.dot(xb, w1_ref[...], preferred_element_type=jnp.float32)
    h1 = jnp.maximum(h1 + b1_ref[...], 0.0)
    # layer 2: (TB,256)bf16 @ (256,128)bf16 -> f32, +bias, ReLU
    h2 = jnp.dot(h1.astype(jnp.bfloat16), w2_ref[...],
                 preferred_element_type=jnp.float32)
    h2 = jnp.maximum(h2 + b2_ref[...], 0.0)
    # layer 3: (TB,128)bf16 @ (128,10)bf16 -> f32, +bias (no activation)
    h3 = jnp.dot(h2.astype(jnp.bfloat16), w3_ref[...],
                 preferred_element_type=jnp.float32)
    o_ref[...] = (h3 + b3_ref[...]).astype(o_ref.dtype)


def prepare_params(params):
    """One-time param prep (hoisted out of the per-call forward): weights are
    kept pre-transposed (in, out) and cast to bf16 MXU operands; biases stay
    f32 as (1, out) rows."""
    w1, b1, w2, b2, w3, b3 = params
    bf = jnp.bfloat16
    return (w1.astype(bf), b1.astype(jnp.float32).reshape(1, H1),
            w2.astype(bf), b2.astype(jnp.float32).reshape(1, H2),
            w3.astype(bf), b3.astype(jnp.float32).reshape(1, OUT_DIM))


def rfml_forward(x, prepared_params, *, batch_tile=2048):
    """x: (B, 100) f32.  prepared_params: output of prepare_params()."""
    w1, b1, w2, b2, w3, b3 = prepared_params
    B = x.shape[0]

    TB = _pick_batch_tile(B, batch_tile)
    pB = _round_up(B, TB)

    # Pad batch rows only when needed; no lane padding (K=100 / N=10 blocks are
    # legal because their last dim equals the full array dim).
    if pB != B:
        xp = jnp.zeros((pB, IN_DIM), x.dtype).at[:B, :].set(x)
    else:
        xp = x

    grid = (pB // TB,)

    def const(shape):
        # weights/biases: constant block index -> stay VMEM-resident across steps
        return pl.BlockSpec(shape, lambda i: (0, 0))

    flops = 2 * pB * (IN_DIM * H1 + H1 * H2 + H2 * OUT_DIM)
    bytes_accessed = (xp.size * 4 + pB * OUT_DIM * 4
                      + w1.size * 2 + w2.size * 2 + w3.size * 2
                      + b1.size * 4 + b2.size * 4 + b3.size * 4)

    out = pl.pallas_call(
        mlp_kernel,
        out_shape=jax.ShapeDtypeStruct((pB, OUT_DIM), jnp.float32),
        grid=grid,
        in_specs=[
            pl.BlockSpec((TB, IN_DIM), lambda i: (i, 0)),   # x: batch-tiled, f32, unpadded lanes
            const((IN_DIM, H1)),                            # w1 (bf16, resident)
            const((1, H1)),                                 # b1 (f32)
            const((H1, H2)),                                # w2
            const((1, H2)),                                 # b2
            const((H2, OUT_DIM)),                           # w3
            const((1, OUT_DIM)),                            # b3
        ],
        out_specs=pl.BlockSpec((TB, OUT_DIM), lambda i: (i, 0)),
        compiler_params=pltpu.CompilerParams(
            dimension_semantics=("parallel",)),             # megacore shard on v7x
        cost_estimate=pl.CostEstimate(
            flops=flops, transcendentals=0, bytes_accessed=bytes_accessed),
    )(xp, w1, b1, w2, b2, w3, b3)

    # strip the batch-padding rows; output width is already the true 10
    return out[:B, :]


def init_params(key):
    # Deterministic synthetic init (shapes from RFMLModel.__init__),
    # stored pre-transposed as (in, out); biases as (1, out) rows.
    k1, k2, k3, k4, k5, k6 = jax.random.split(key, 6)
    w1 = jax.random.normal(k1, (IN_DIM, H1), jnp.float32) * 0.05
    b1 = jax.random.normal(k2, (1, H1), jnp.float32) * 0.05
    w2 = jax.random.normal(k3, (H1, H2), jnp.float32) * 0.05
    b2 = jax.random.normal(k4, (1, H2), jnp.float32) * 0.05
    w3 = jax.random.normal(k5, (H2, OUT_DIM), jnp.float32) * 0.05
    b3 = jax.random.normal(k6, (1, OUT_DIM), jnp.float32) * 0.05
    return (w1, b1, w2, b2, w3, b3)


def reference_forward_f32(x, params):
    w1, b1, w2, b2, w3, b3 = params
    h = jnp.maximum(x @ w1 + b1, 0.0)
    h = jnp.maximum(h @ w2 + b2, 0.0)
    return h @ w3 + b3


def reference_forward_bf16(x, params):
    # Matches kernel numerics: bf16 matmul operands, f32 accumulate/elementwise.
    w1, b1, w2, b2, w3, b3 = params
    bf = jnp.bfloat16
    h = jnp.dot(x.astype(bf), w1.astype(bf), preferred_element_type=jnp.float32)
    h = jnp.maximum(h + b1, 0.0)
    h = jnp.dot(h.astype(bf), w2.astype(bf), preferred_element_type=jnp.float32)
    h = jnp.maximum(h + b2, 0.0)
    h = jnp.dot(h.astype(bf), w3.astype(bf), preferred_element_type=jnp.float32)
    return h + b3


if __name__ == "__main__":
    key = jax.random.PRNGKey(0)
    kx, kp = jax.random.split(key)

    B = 8  # small batch; wrapper pads only the batch rows to a 16-row tile
    x = jax.random.normal(kx, (B, IN_DIM), jnp.float32)
    params = init_params(kp)
    prepped = prepare_params(params)   # one-time weight prep, hoisted out of forward

    out = rfml_forward(x, prepped)
    out = jax.block_until_ready(out)
    assert out.shape == (B, OUT_DIM)

    # Tight check vs. a numerics-matched (bf16-matmul, f32-accumulate) reference.
    ref_bf16 = reference_forward_bf16(x, params)
    assert jnp.allclose(out, ref_bf16, atol=1e-3, rtol=1e-3), "mismatch vs bf16 reference"

    # Loose check vs. the pure-f32 module semantics (bf16 MXU inputs lose ~3 digits).
    ref_f32 = reference_forward_f32(x, params)
    assert jnp.allclose(out, ref_f32, atol=3e-2, rtol=3e-2), "mismatch vs f32 reference"

    print("KERNEL_OK")
</pallas_src>

<mosaic_0001>
module attributes {stable_mosaic.version = 11 : i64} {
  func.func @mlp_kernel(%arg0: i32, %arg1: memref<16x100xf32, #tpu.memory_space<vmem>>, %arg2: memref<100x256xbf16, #tpu.memory_space<vmem>>, %arg3: memref<1x256xf32, #tpu.memory_space<vmem>>, %arg4: memref<256x128xbf16, #tpu.memory_space<vmem>>, %arg5: memref<1x128xf32, #tpu.memory_space<vmem>>, %arg6: memref<128x10xbf16, #tpu.memory_space<vmem>>, %arg7: memref<1x10xf32, #tpu.memory_space<vmem>>, %arg8: memref<16x10xf32, #tpu.memory_space<vmem>>) attributes {dimension_semantics = [#tpu.dimension_semantics<parallel>], iteration_bounds = array<i64: 1>, scalar_prefetch = 0 : i64, scratch_operands = 0 : i64, tpu.core_type = #tpu.core_type<tc>, window_params = [{transform_indices = @transform_0, window_bounds = array<i64: 16, 100>}, {pipeline_mode = #tpu.pipeline_mode<synchronous>, transform_indices = @transform_1, window_bounds = array<i64: 100, 256>}, {pipeline_mode = #tpu.pipeline_mode<synchronous>, transform_indices = @transform_2, window_bounds = array<i64: 1, 256>}, {pipeline_mode = #tpu.pipeline_mode<synchronous>, transform_indices = @transform_3, window_bounds = array<i64: 256, 128>}, {pipeline_mode = #tpu.pipeline_mode<synchronous>, transform_indices = @transform_4, window_bounds = array<i64: 1, 128>}, {pipeline_mode = #tpu.pipeline_mode<synchronous>, transform_indices = @transform_5, window_bounds = array<i64: 128, 10>}, {pipeline_mode = #tpu.pipeline_mode<synchronous>, transform_indices = @transform_6, window_bounds = array<i64: 1, 10>}, {transform_indices = @transform_7, window_bounds = array<i64: 16, 10>}]} {
    %c0 = arith.constant 0 : index
    %c0_0 = arith.constant 0 : index
    %0 = vector.load %arg1[%c0, %c0_0] : memref<16x100xf32, #tpu.memory_space<vmem>>, vector<16x100xf32>
    %1 = arith.truncf %0 : vector<16x100xf32> to vector<16x100xbf16>
    %c0_1 = arith.constant 0 : index
    %c0_2 = arith.constant 0 : index
    %2 = vector.load %arg2[%c0_1, %c0_2] : memref<100x256xbf16, #tpu.memory_space<vmem>>, vector<100x256xbf16>
    %cst = arith.constant dense<0.000000e+00> : vector<16x256xf32>
    %3 = tpu.matmul %1, %2, %cst {dimension_numbers = #tpu.dot_dimension_numbers<[1], [0], [0], [1], [0, 0, 1, 1], [], []>} : vector<16x100xbf16>, vector<100x256xbf16>, vector<16x256xf32> -> vector<16x256xf32>
    %c0_3 = arith.constant 0 : index
    %c0_4 = arith.constant 0 : index
    %4 = vector.load %arg3[%c0_3, %c0_4] : memref<1x256xf32, #tpu.memory_space<vmem>>, vector<1x256xf32>
    %5 = vector.broadcast %4 : vector<1x256xf32> to vector<16x256xf32>
    %6 = arith.addf %3, %5 : vector<16x256xf32>
    %cst_5 = arith.constant 0.000000e+00 : f32
    %7 = vector.broadcast %cst_5 : f32 to vector<16x256xf32>
    %8 = arith.maximumf %6, %7 : vector<16x256xf32>
    %9 = arith.truncf %8 : vector<16x256xf32> to vector<16x256xbf16>
    %c0_6 = arith.constant 0 : index
    %c0_7 = arith.constant 0 : index
    %10 = vector.load %arg4[%c0_6, %c0_7] : memref<256x128xbf16, #tpu.memory_space<vmem>>, vector<256x128xbf16>
    %cst_8 = arith.constant dense<0.000000e+00> : vector<16x128xf32>
    %11 = tpu.matmul %9, %10, %cst_8 {dimension_numbers = #tpu.dot_dimension_numbers<[1], [0], [0], [1], [0, 0, 1, 1], [], []>} : vector<16x256xbf16>, vector<256x128xbf16>, vector<16x128xf32> -> vector<16x128xf32>
    %c0_9 = arith.constant 0 : index
    %c0_10 = arith.constant 0 : index
    %12 = vector.load %arg5[%c0_9, %c0_10] : memref<1x128xf32, #tpu.memory_space<vmem>>, vector<1x128xf32>
    %13 = vector.broadcast %12 : vector<1x128xf32> to vector<16x128xf32>
    %14 = arith.addf %11, %13 : vector<16x128xf32>
    %cst_11 = arith.constant 0.000000e+00 : f32
    %15 = vector.broadcast %cst_11 : f32 to vector<16x128xf32>
    %16 = arith.maximumf %14, %15 : vector<16x128xf32>
    %17 = arith.truncf %16 : vector<16x128xf32> to vector<16x128xbf16>
    %c0_12 = arith.constant 0 : index
    %c0_13 = arith.constant 0 : index
    %18 = vector.load %arg6[%c0_12, %c0_13] : memref<128x10xbf16, #tpu.memory_space<vmem>>, vector<128x10xbf16>
    %cst_14 = arith.constant dense<0.000000e+00> : vector<16x10xf32>
    %19 = tpu.matmul %17, %18, %cst_14 {dimension_numbers = #tpu.dot_dimension_numbers<[1], [0], [0], [1], [0, 0, 1, 1], [], []>} : vector<16x128xbf16>, vector<128x10xbf16>, vector<16x10xf32> -> vector<16x10xf32>
    %c0_15 = arith.constant 0 : index
    %c0_16 = arith.constant 0 : index
    %20 = vector.load %arg7[%c0_15, %c0_16] : memref<1x10xf32, #tpu.memory_space<vmem>>, vector<1x10xf32>
    %21 = vector.broadcast %20 : vector<1x10xf32> to vector<16x10xf32>
    %22 = arith.addf %19, %21 : vector<16x10xf32>
    %c0_17 = arith.constant 0 : index
    %c0_18 = arith.constant 0 : index
    %23 = vector.load %arg8[%c0_17, %c0_18] : memref<16x10xf32, #tpu.memory_space<vmem>>, vector<16x10xf32>
    tpu.vector_store %arg8[%c0_17, %c0_18], %22 {strides = array<i32>} : memref<16x10xf32, #tpu.memory_space<vmem>>, vector<16x10xf32>,
    return
  }
  func.func @transform_0(%arg0: i32) -> (i32, i32) {
    %c0_i32 = arith.constant 0 : i32
    %c0_i32_0 = arith.constant 0 : i32
    return %arg0, %c0_i32 : i32, i32
  }
  func.func @transform_1(%arg0: i32) -> (i32, i32) {
    %c0_i32 = arith.constant 0 : i32
    %c0_i32_0 = arith.constant 0 : i32
    %c0_i32_1 = arith.constant 0 : i32
    return %c0_i32, %c0_i32_0 : i32, i32
  }
  func.func @transform_2(%arg0: i32) -> (i32, i32) {
    %c0_i32 = arith.constant 0 : i32
    %c0_i32_0 = arith.constant 0 : i32
    %c0_i32_1 = arith.constant 0 : i32
    return %c0_i32, %c0_i32_0 : i32, i32
  }
  func.func @transform_3(%arg0: i32) -> (i32, i32) {
    %c0_i32 = arith.constant 0 : i32
    %c0_i32_0 = arith.constant 0 : i32
    %c0_i32_1 = arith.constant 0 : i32
    return %c0_i32, %c0_i32_0 : i32, i32
  }
  func.func @transform_4(%arg0: i32) -> (i32, i32) {
    %c0_i32 = arith.constant 0 : i32
    %c0_i32_0 = arith.constant 0 : i32
    %c0_i32_1 = arith.constant 0 : i32
    return %c0_i32, %c0_i32_0 : i32, i32
  }
  func.func @transform_5(%arg0: i32) -> (i32, i32) {
    %c0_i32 = arith.constant 0 : i32
    %c0_i32_0 = arith.constant 0 : i32
    %c0_i32_1 = arith.constant 0 : i32
    return %c0_i32, %c0_i32_0 : i32, i32
  }
  func.func @transform_6(%arg0: i32) -> (i32, i32) {
    %c0_i32 = arith.constant 0 : i32
    %c0_i32_0 = arith.constant 0 : i32
    %c0_i32_1 = arith.constant 0 : i32
    return %c0_i32, %c0_i32_0 : i32, i32
  }
  func.func @transform_7(%arg0: i32) -> (i32, i32) {
    %c0_i32 = arith.constant 0 : i32
    %c0_i32_0 = arith.constant 0 : i32
    return %arg0, %c0_i32 : i32, i32
  }
}

</mosaic_0001>

<bundles_post_ra>
// kernel: tpu_custom_call.1
= control target key start
LH: loop header
LB: loop body
LE: loop exit
PB: predicated region body
PF: predicated region fallthrough
CT: control target
= control target key end

     0   :  { %12 = vsyncpa [#allocation3], 0  ;;  %s874_s0 = inlined_call_operand.vmem [shape: f32[16,100], index: 0, kind: input, shape index: {}]   ;;  %s875_s1 = inlined_call_operand.hbm [shape: bf16[100,256], index: 1, kind: input, shape index: {}]   ;;  %s876_s2 = inlined_call_operand.vmem [shape: f32[1,256], index: 2, kind: input, shape index: {}]   ;;  %s877_s3 = inlined_call_operand.hbm [shape: bf16[256,128], index: 3, kind: input, shape index: {}]   ;;  %s878_s4 = inlined_call_operand.vmem [shape: f32[1,128], index: 4, kind: input, shape index: {}]   ;;  %s879_s5 = inlined_call_operand.vmem [shape: bf16[128,10], index: 5, kind: input, shape index: {}]   ;;  %s880_s6 = inlined_call_operand.vmem [shape: f32[1,10], index: 6, kind: input, shape index: {}]   ;;  %s881_s7 = inlined_call_operand.hbm [shape: f32[16,10], index: 7, kind: output, shape index: {}]  }
   0x1   :  { %13 = vsyncpa [#allocation6], 0 }
   0x2   :  { %14 = vsyncpa [#allocation4], 0  ;;  %s740_s24 = smov [#allocation2]   ;;  %s668_s28 = scalar_lea.hbm %s875_s1, 1664 }
   0x3   :  { %s22_s25 = sshll.u32 %s740_s24, 4  ;;  %p669_p0 = scmp.ne.s32.totalorder %s875_s1, %s668_s28  ;;  %s23_s25 = int_to_ptr.vmem [resolvable:$true] %s22_s25 }
   0x4   :  { %p672_p1 = scmp.lt.u32.totalorder %s668_s28, %s875_s1 }
   0x6   :  { %p674_p2 = pnand %p672_p1, %p669_p0 }
   0x8   :  { %677 = shalt.err (!%p674_p2)
}
   0x9   :  { %s678_s10 = scalar_lea.vmem %s23_s25, 1664  ;;  %p683_p4 = scmp.lt.s32.totalorder %s23_s25, %s23_s25 }
   0xa   :  { %p679_p3 = scmp.ne.s32.totalorder %s23_s25, %s678_s10  ;;  %p684_p5 = scmp.lt.s32.totalorder %s678_s10, %s678_s10 }
   0xc   :  { %p685_p6 = por %p684_p5, %p683_p4 }
   0xe   :  { %p686_p7 = pnand %p685_p6, %p679_p3 }
  0x10   :  { %689 = shalt.err (!%p686_p7)
}
  0x11   :  { %s741_s11 = smov 128   ;;  %s742_s12 = smov 8  }
  0x12   :  { %28 = dma.hbm_to_vmem [thread:$0]  %s875_s1, 1664, %s23_s25, [#allocation3], %s741_s11, %s741_s11, %s742_s12  }
  0x13   :  { %s743_s15 = smov [#allocation5]   ;;  %s690_s19 = scalar_lea.hbm %s877_s3, 2048 }
  0x14   :  { %s36_s16 = sshll.u32 %s743_s15, 4  ;;  %p691_p8 = scmp.ne.s32.totalorder %s877_s3, %s690_s19  ;;  %s37_s16 = int_to_ptr.vmem [resolvable:$true] %s36_s16 }
  0x15   :  { %p694_p9 = scmp.lt.u32.totalorder %s690_s19, %s877_s3 }
  0x17   :  { %p696_p10 = pnand %p694_p9, %p691_p8 }
  0x19   :  { %699 = shalt.err (!%p696_p10)
}
  0x1a   :  { %s700_s24 = scalar_lea.vmem %s37_s16, 2048  ;;  %p705_p12 = scmp.lt.s32.totalorder %s37_s16, %s37_s16 }
  0x1b   :  { %p701_p11 = scmp.ne.s32.totalorder %s37_s16, %s700_s24  ;;  %p706_p13 = scmp.lt.s32.totalorder %s700_s24, %s700_s24 }
  0x1d   :  { %p707_p0 = por %p706_p13, %p705_p12 }
  0x1f   :  { %p708_p1 = pnand %p707_p0, %p701_p11 }
  0x21   :  { %711 = shalt.err (!%p708_p1)
}
  0x22   :  { %s744_s1 = smov 64   ;;  %s745_s25 = smov 4  }
  0x23   :  { %42 = dma.hbm_to_vmem [thread:$0]  %s877_s3, 2048, %s37_s16, [#allocation6], %s744_s1, %s744_s1, %s745_s25  }
  0x24   :  { %734 = dma.done.wait [#allocation3], 1664  }
  0x25   :  { %735 = vsyncadd [#allocation3], 4294965632 }
  0x26   :  { %736 = dma.done.wait [#allocation6], 2048  }
  0x27   :  { %737 = vsyncadd [#allocation6], 4294965248  ;;  %v746_v0 = vmov 0   ;;  %v624_v1 = vld [vmem:[#allocation2 + $0x4] ss:$8 sps:$4 sm:$0xff]   ;;  %v646_v13 = vld [vmem:[#allocation5 + $0x48] sm:$0xff]   ;;  %v74_v42 = vlaneseq }
  0x28   :  { %192 = vmatprep.mubr.bf16.mxu0 %v746_v0  ;;  %v626_v2 = vld [vmem:[#allocation2] ss:$8 sps:$4 sm:$0xff]   ;;  %160 = vmatprep.subr.bf16.mxu0 %v624_v1  ;;  %v627_v3 = vld [vmem:[#allocation2 + $0x14] ss:$8 sps:$4 sm:$0xff]   ;;  %v629_v4 = vld [vmem:[#allocation2 + $0x10] ss:$8 sps:$4 sm:$0xff]  }
  0x29   :  { %161 = vmatpush1.bf16.msra.mxu0 %v626_v2  ;;  %v630_v5 = vld [vmem:[#allocation2 + $0x24] ss:$8 sps:$4 sm:$0xff]   ;;  %v632_v6 = vld [vmem:[#allocation2 + $0x20] ss:$8 sps:$4 sm:$0xff]   ;;  %v633_v7 = vld [vmem:[#allocation2 + $0x34] ss:$8 sps:$4 sm:$0xff]  }
  0x2a   :  { %162 = vmatprep.subr.bf16.mxu0 %v627_v3  ;;  %v635_v8 = vld [vmem:[#allocation2 + $0x30] ss:$8 sps:$4 sm:$0xff]   ;;  %v644_v9 = vld [vmem:[#allocation5 + $0x40] sm:$0xff]   ;;  %v71_v12 = vld [vmem:[#allocation2 + $0x60] sm:$0x33]  ;;  %vm153_vm0 = vcmask 1041408  }
  0x2b   :  { %v636_v10 = vld [vmem:[#allocation2 + $0x44] ss:$8 sps:$4 sm:$0xff]   ;;  %563 = vmatprep.subr.bf16.mxu1 %v644_v9  ;;  %v647_v14 = vld [vmem:[#allocation5 + $0x8] sm:$0xff]   ;;  %v648_v15 = vld [vmem:[#allocation5 + $0x50] sm:$0xff]   ;;  %v533_v18 = vcombine.low %v71_v12, %v71_v12  ;;  %vm149_vm1 = vcmask 818176   ;;  %v534_v23 = vcombine.high %v71_v12, %v71_v12  ;;  %v747_v37 = vmov 0.0  }
  0x2c   :  { %v645_v11 = vld [vmem:[#allocation5] sm:$0xff]   ;;  %v639_v17 = vld [vmem:[#allocation2 + $0x54] ss:$8 sps:$4 sm:$0xff]   ;;  %v650_v20 = vld [vmem:[#allocation5 + $0x58] sm:$0xff]   ;;  %v75_v43 = vshrl.u32 %v74_v42, 7  ;;  %vm748_vm2 = vmmov 0  }
  0x2d   :  { %163 = vmatpush1.bf16.msra.mxu0 %v629_v4  ;;  %564 = vmatpush3.bf16.msra.mxu1 %v645_v11  ;;  %v638_v16 = vld [vmem:[#allocation2 + $0x40] ss:$8 sps:$4 sm:$0xff]   ;;  %v649_v19 = vld [vmem:[#allocation5 + $0x10] sm:$0xff]   ;;  %v155_v24 = vsel %vm153_vm0, %v533_v18, 0  ;;  %v654_v29 = vld [vmem:[#allocation5 + $0x68] sm:$0xff]   ;;  %vm500_vm3 = vcmask 80896  }
  0x2e   :  { %164 = vmatprep.subr.bf16.mxu0 %v630_v5  ;;  %565 = vmatprep.subr.bf16.mxu1 %v646_v13  ;;  %v641_v21 = vld [vmem:[#allocation2 + $0x50] ss:$8 sps:$4 sm:$0xff]   ;;  %v651_v22 = vld [vmem:[#allocation5 + $0x18] sm:$0xff]   ;;  %v652_v25 = vld [vmem:[#allocation5 + $0x60] sm:$0xff]   ;;  %v76_v44 = vsub.s32 0, %v75_v43  ;;  %v80_v46 = vsub.s32 1, %v75_v43 }
  0x2f   :  { %v56_v26 = vld [vmem:[%s874_s0] sm:$0xff]  ;;  %v57_v27 = vld [vmem:[%s874_s0 + $0x8] sm:$0xff]  ;;  %v655_v31 = vld [vmem:[#allocation5 + $0x28] sm:$0xff]   ;;  %s749_s3 = smov [#allocation7]  }
  0x30   :  { %v653_v28 = vld [vmem:[#allocation5 + $0x20] sm:$0xff]   ;;  %v58_v30 = vpack.c.bf16 %v57_v27, %v56_v26  ;;  %v656_v32 = vld [vmem:[#allocation5 + $0x70] sm:$0xff]   ;;  %v658_v34 = vld [vmem:[#allocation5 + $0x78] sm:$0xff]   ;;  %s508_s28 = sshll.u32 %s749_s3, 4  ;;  %s509_s28 = int_to_ptr.vmem [resolvable:$true] %s508_s28 }
  0x31   :  { %165 = vmatpush1.bf16.msra.mxu0 %v632_v6  ;;  %566 = vmatpush3.bf16.msra.mxu1 %v647_v14  ;;  %v657_v33 = vld [vmem:[#allocation5 + $0x30] sm:$0xff]   ;;  %v659_v35 = vld [vmem:[#allocation5 + $0x38] sm:$0xff]   ;;  %v661_v38 = vld [vmem:[%s879_s5 + $0x8] sm:$0xff]   ;;  %p717_p3 = scmp.lt.s32.totalorder %s509_s28, %s509_s28 }
  0x32   :  { %166 = vmatprep.subr.bf16.mxu0 %v633_v7  ;;  %567 = vmatprep.subr.bf16.mxu1 %v648_v15  ;;  %v660_v36 = vld [vmem:[%s879_s5] sm:$0xff]   ;;  %v662_v39 = vld [vmem:[%s879_s5 + $0x10] sm:$0xff]   ;;  %v663_v40 = vld [vmem:[%s879_s5 + $0x18] sm:$0xff]  }
  0x33   :  { %v664_v41 = vld [vmem:[%s879_s5 + $0x20] sm:$0xff]   ;;  %v665_v63 = vld [vmem:[%s879_s5 + $0x28] sm:$0xff]   ;;  %v666_v0 = vld [vmem:[%s879_s5 + $0x30] sm:$0xff]  }
  0x34   :  { %v72_v45 = vld [vmem:[%s876_s2] sm:$0x3]  ;;  %v667_v1 = vld [vmem:[%s879_s5 + $0x38] sm:$0xff]  }
  0x35   :  { %167 = vmatpush1.bf16.msra.mxu0 %v635_v8  ;;  %568 = vmatpush3.bf16.msra.mxu1 %v649_v19  ;;  %v77_v47 = vrot.slane %v72_v45, %v76_v44  ;;  %v81_v48 = vrot.slane %v72_v45, %v80_v46  ;;  %v537_v3 = vld [vmem:[%s878_s4] ss:$0 sm:$0xff]  ;;  %s712_s4 = scalar_lea.vmem %s509_s28, 256 }
  0x36   :  { %168 = vmatprep.subr.bf16.mxu0 %v636_v10  ;;  %569 = vmatprep.subr.bf16.mxu1 %v650_v20  ;;  %v554_v14 = vld [vmem:[%s880_s6] ss:$0 sm:$0xff]  ;;  %p713_p2 = scmp.ne.s32.totalorder %s509_s28, %s712_s4  ;;  %p718_p4 = scmp.lt.s32.totalorder %s712_s4, %s712_s4 }
  0x38   :  { %p719_p5 = por %p718_p4, %p717_p3 }
  0x39   :  { %169 = vmatpush1.bf16.msra.mxu0 %v638_v16  ;;  %570 = vmatpush3.bf16.msra.mxu1 %v651_v22 }
  0x3a   :  { %170 = vmatprep.subr.bf16.mxu0 %v639_v17  ;;  %571 = vmatprep.subr.bf16.mxu1 %v652_v25  ;;  %p720_p6 = pnand %p719_p5, %p713_p2 }
  0x3d   :  { %171 = vmatpush1.bf16.msra.mxu0 %v641_v21  ;;  %572 = vmatpush3.bf16.msra.mxu1 %v653_v28 }
  0x3e   :  { %535 = vmatprep.subr.msk.bf16.mxu0 %vm153_vm0, %v534_v23  ;;  %573 = vmatprep.subr.bf16.mxu1 %v654_v29 }
  0x41   :  { %173 = vmatpush1.bf16.msra.mxu0 %v155_v24  ;;  %574 = vmatpush3.bf16.msra.mxu1 %v655_v31 }
  0x42   :  { %575 = vmatprep.subr.bf16.mxu1 %v656_v32  ;;  %594 = vmatprep.subr.bf16.mxu0 %v747_v37 }
  0x44   :  { %536 = vmatmul.mubr.msk.bf16.vlgmr.msra.gmra.mrb[0].mxu0 %vm149_vm1, %v58_v30 }
  0x45   :  { %576 = vmatpush3.bf16.msra.mxu1 %v657_v33  ;;  %595 = vmatpush3.bf16.msra.mxu0 %v660_v36 }
  0x46   :  { %577 = vmatprep.subr.bf16.mxu1 %v658_v34  ;;  %596 = vmatprep.subr.bf16.mxu0 %v747_v37 }
  0x47   :  { %610 = vmatprep.mubr.msk.bf16.mxu0 %vm748_vm2, %v747_v37 }
  0x49   :  { %578 = vmatpush3.bf16.msra.mxu1 %v659_v35  ;;  %597 = vmatpush3.bf16.msra.mxu0 %v661_v38 }
  0x4a   :  { %598 = vmatprep.subr.bf16.mxu0 %v747_v37 }
  0x4d   :  { %599 = vmatpush3.bf16.msra.mxu0 %v662_v39 }
  0x4e   :  { %600 = vmatprep.subr.bf16.mxu0 %v747_v37 }
  0x51   :  { %601 = vmatpush3.bf16.msra.mxu0 %v663_v40 }
  0x52   :  { %602 = vmatprep.subr.bf16.mxu0 %v747_v37 }
  0x55   :  { %603 = vmatpush3.bf16.msra.mxu0 %v664_v41 }
  0x56   :  { %604 = vmatprep.subr.bf16.mxu0 %v747_v37 }
  0x59   :  { %605 = vmatpush3.bf16.msra.mxu0 %v665_v63 }
  0x5a   :  { %606 = vmatprep.subr.bf16.mxu0 %v747_v37 }
  0x5d   :  { %607 = vmatpush3.bf16.msra.mxu0 %v666_v0 }
  0x5e   :  { %608 = vmatprep.subr.bf16.mxu0 %v747_v37 }
  0x61   :  { %609 = vmatpush3.bf16.msra.mxu0 %v667_v1 }
 0x117   :  { %v194_v49 = vpop.f32.mrb[0].mxu0 }
 0x118   :  { %v195_v50 = vadd.f32 %v194_v49, %v77_v47  ;;  %v196_v51 = vpop.f32.mrb[1].mxu0 }
 0x119   :  { %v197_v52 = vadd.f32 %v196_v51, %v81_v48  ;;  %v198_v53 = vpop.f32.mrb[2].mxu0 }
 0x11a   :  { %v199_v54 = vadd.f32 %v198_v53, %v77_v47  ;;  %v200_v55 = vpop.f32.mrb[3].mxu0  ;;  %v203_v57 = vmax.f32 %v195_v50, 0.0 }
 0x11b   :  { %v201_v56 = vadd.f32 %v200_v55, %v81_v48  ;;  %v204_v59 = vmax.f32 %v197_v52, 0.0 }
 0x11c   :  { %v205_v58 = vmax.f32 %v199_v54, 0.0 }
 0x11d   :  { %v206_v60 = vmax.f32 %v201_v56, 0.0 }
 0x11e   :  { %v207_v61 = vpack.c.bf16 %v205_v58, %v203_v57 }
 0x11f   :  { %v208_v62 = vpack.c.bf16 %v206_v60, %v204_v59 }
 0x121   :  { %376 = vmatprep.mubr.bf16.mxu1 %v208_v62 }
 0x122   :  { %377 = vmatmul.mubr.bf16.vlgmr.msra.gmra.mrb[0].mxu1 %v207_v61 }
 0x1f5   :  { %v579_v2 = vpop.f32.mrb[0].mxu1 }
 0x1f6   :  { %v580_v4 = vpop.f32.mrb[1].mxu1 }
 0x1f7   :  { %v581_v5 = vadd.f32 %v580_v4, %v579_v2  ;;  %v582_v6 = vpop.f32.mrb[2].mxu1 }
 0x1f8   :  { %v583_v7 = vpop.f32.mrb[3].mxu1 }
 0x1f9   :  { %v379_v8 = vadd.f32 %v581_v5, %v537_v3  ;;  %v584_v9 = vadd.f32 %v583_v7, %v582_v6 }
 0x1fb   :  { %v382_v10 = vadd.f32 %v584_v9, %v537_v3  ;;  %v385_v11 = vmax.f32 %v379_v8, 0.0 }
 0x1fd   :  { %v386_v12 = vmax.f32 %v382_v10, 0.0 }
 0x1ff   :  { %v387_v13 = vpack.c.bf16 %v386_v12, %v385_v11 }
 0x201   :  { %611 = vmatmul.mubr.bf16.vlgmr.msra.gmra.mrb[4].mxu0 %v387_v13 }
 0x2d4   :  { %v493_v15 = vpop.f32.mrb[4].mxu0 }
 0x2d5   :  { %v494_v16 = vadd.f32 %v554_v14, %v493_v15  ;;  %v612_v17 = vpop.f32.mrb[5].mxu0 }
 0x2d6   :  { %v496_v18 = vpop.f32.mrb[6].mxu0 }
 0x2d7   :  { %v497_v19 = vadd.f32 %v554_v14, %v496_v18  ;;  %v613_v20 = vpop.f32.mrb[7].mxu0  ;;  %501 = vst.msk [vmem:[#allocation7] sm:$0xff] %vm500_vm3, %v494_v16 }
 0x2d9   :  { %502 = vst.msk [vmem:[#allocation7 + $0x8] sm:$0xff] %vm500_vm3, %v497_v19 }
 0x2da   :  { %723 = shalt.err (!%p720_p6)
}
 0x2db   :  { %s724_s30 = scalar_lea.hbm %s881_s7, 256 }
 0x2dc   :  { %p725_p7 = scmp.ne.s32.totalorder %s881_s7, %s724_s30  ;;  %p728_p8 = scmp.lt.u32.totalorder %s724_s30, %s881_s7 }
 0x2de   :  { %p730_p9 = pnand %p728_p8, %p725_p7 }
 0x2e0   :  { %733 = shalt.err (!%p730_p9)
}
 0x2e1   :  { %514 = dma.vmem_to_hbm [thread:$0]  %s509_s28, 256, %s881_s7, [#allocation4], %s741_s11, %s741_s11, %s742_s12  }
 0x2e2   :  { %738 = dma.done.wait [#allocation4], 256  }
 0x2e3   :  { %739 = vsyncadd [#allocation4], 4294967040 }
 0x2e4   :  { %518 = vsyncpa [#allocation3], 1 }
 0x2e5   :  { %519 = vsyncpa [#allocation6], 1 }
 0x2e6   :  { %520 = vsyncpa [#allocation4], 1 }

</bundles_post_ra>
